<compile_context>
chip_gen: v6e
topology: v6e:2x2x1
jax: 0.10.0
libtpu: 0.0.40
codegen_flags: <defaults>
</compile_context>

<pallas_src>
import jax
import jax.numpy as jnp
from jax.experimental import pallas as pl
from jax.experimental.pallas import tpu as pltpu


def _round_up(x, n):
    return (x + n - 1) // n * n


def _text_proj_kernel(x_ref, w1_ref, b1_ref, w2_ref, b2_ref, o_ref, acc_ref):
    # x_ref:  [tile_m, tile_k]        (one K slab of the row tile)
    # w1_ref: [tile_k, hidden]        b1_ref: [1, hidden]
    # w2_ref: [hidden, out_features]  b2_ref: [1, out_features]
    # o_ref:  [tile_m, out_features]  acc_ref: [tile_m, hidden] f32 scratch
    k = pl.program_id(1)

    @pl.when(k == 0)
    def _():
        acc_ref[...] = jnp.zeros_like(acc_ref)

    # linear_1 partial product: operands go to the MXU in their native dtype
    # (bf16 fast path), accumulation in f32.
    acc_ref[...] += jnp.dot(x_ref[...], w1_ref[...],
                            preferred_element_type=jnp.float32)

    @pl.when(k == pl.num_programs(1) - 1)
    def _():
        h = acc_ref[...] + b1_ref[...].astype(jnp.float32)
        # GELU(approximate='tanh'): 0.5*x*(1 + tanh(sqrt(2/pi)*(x + 0.044715*x^3)))
        c = jnp.float32(0.7978845608028654)  # sqrt(2/pi)
        h = 0.5 * h * (1.0 + jnp.tanh(c * (h + 0.044715 * h * h * h)))
        # linear_2: feed the MXU in the weights' storage dtype, accumulate in f32.
        y = jnp.dot(h.astype(w2_ref.dtype), w2_ref[...],
                    preferred_element_type=jnp.float32)
        y = y + b2_ref[...].astype(jnp.float32)
        o_ref[...] = y.astype(o_ref.dtype)


def pixart_alpha_text_projection(caption, w1, b1, w2, b2):
    """caption: [..., in_features] -> [..., out_features].

    w1: [in_features, hidden], b1: [hidden], w2: [hidden, out], b2: [out]
    (weights pre-transposed vs. PyTorch nn.Linear). For best throughput pass
    caption/w1/w2 in bf16; the kernel accumulates in f32 either way.
    """
    in_features = caption.shape[-1]
    hidden = w1.shape[1]
    out_features = w2.shape[1]
    lead = caption.shape[:-1]
    m = 1
    for d in lead:
        m *= d

    x2d = caption.reshape(m, in_features)

    # --- M (row) tiling: pad rows with zeros, extra rows sliced off afterwards.
    m16 = _round_up(max(m, 1), 16)
    if m16 <= 512:
        tile_m, m_pad = m16, m16
    else:
        tile_m = 256
        m_pad = _round_up(m, tile_m)

    # --- K (contraction) tiling: pad to a multiple of 128 (zero pads contribute
    # nothing to the matmul), then pick the largest 128-multiple tile <= 512
    # that divides it exactly.
    in_pad = _round_up(in_features, 128)
    tile_k = next(c for c in (512, 384, 256, 128) if in_pad % c == 0)

    if (m_pad, in_pad) != (m, in_features):
        x2d = jnp.pad(x2d, ((0, m_pad - m), (0, in_pad - in_features)))
    w1_p = jnp.pad(w1, ((0, in_pad - in_features), (0, 0))) if in_pad != in_features else w1
    b1_2d = b1.reshape(1, hidden)
    b2_2d = b2.reshape(1, out_features)

    num_m = m_pad // tile_m
    num_k = in_pad // tile_k

    flops = 2 * m_pad * (in_pad * hidden + hidden * out_features)
    transcendentals = m_pad * hidden  # one tanh per hidden activation
    bytes_accessed = (
        x2d.size * x2d.dtype.itemsize
        + w1_p.size * w1_p.dtype.itemsize
        + w2.size * w2.dtype.itemsize
        + b1.size * b1.dtype.itemsize
        + b2.size * b2.dtype.itemsize
        + m_pad * out_features * caption.dtype.itemsize
    )

    out = pl.pallas_call(
        _text_proj_kernel,
        out_shape=jax.ShapeDtypeStruct((m_pad, out_features), caption.dtype),
        grid_spec=pltpu.PrefetchScalarGridSpec(
            num_scalar_prefetch=0,
            grid=(num_m, num_k),
            in_specs=[
                # activations: tiled over rows (parallel) and K (reduction)
                pl.BlockSpec((tile_m, tile_k), lambda i, k: (i, k)),
                # W1: tiled over K only; resident across row tiles
                pl.BlockSpec((tile_k, hidden), lambda i, k: (k, 0)),
                # b1 / W2 / b2: constant index_map -> stay resident in VMEM
                pl.BlockSpec((1, hidden), lambda i, k: (0, 0)),
                pl.BlockSpec((hidden, out_features), lambda i, k: (0, 0)),
                pl.BlockSpec((1, out_features), lambda i, k: (0, 0)),
            ],
            out_specs=pl.BlockSpec((tile_m, out_features), lambda i, k: (i, 0)),
            scratch_shapes=[pltpu.VMEM((tile_m, hidden), jnp.float32)],
        ),
        compiler_params=pltpu.CompilerParams(
            # M tiles shard across TensorCores on v7x megacore; K is a reduction.
            dimension_semantics=("parallel", "arbitrary"),
            # Stay within v7x's 64 MiB physical VMEM while allowing big blocks.
            vmem_limit_bytes=48 * 1024 * 1024,
        ),
        cost_estimate=pl.CostEstimate(
            flops=flops,
            transcendentals=transcendentals,
            bytes_accessed=bytes_accessed,
        ),
    )(x2d, w1_p, b1_2d, w2, b2_2d)

    if m_pad != m:
        out = out[:m]
    return out.reshape(*lead, out_features)


def _reference(caption, w1, b1, w2, b2):
    x = caption.astype(jnp.float32)
    h = x @ w1.astype(jnp.float32) + b1.astype(jnp.float32)
    c = 0.7978845608028654
    h = 0.5 * h * (1.0 + jnp.tanh(c * (h + 0.044715 * h ** 3)))
    y = h @ w2.astype(jnp.float32) + b2.astype(jnp.float32)
    return y.astype(caption.dtype)


if __name__ == "__main__":
    # Small shapes consistent with the module: caption [batch, seq, in_features].
    batch, seq = 2, 8
    in_features, hidden_size = 32, 64
    out_features = hidden_size  # out_features defaults to hidden_size

    key = jax.random.PRNGKey(0)
    k_cap, k_w1, k_b1, k_w2, k_b2 = jax.random.split(key, 5)

    caption = jax.random.normal(k_cap, (batch, seq, in_features), jnp.float32)
    # Deterministic synthetic parameters (pre-transposed layout: [in, out]).
    w1 = jax.random.normal(k_w1, (in_features, hidden_size), jnp.float32) * 0.02
    b1 = jax.random.normal(k_b1, (hidden_size,), jnp.float32) * 0.02
    w2 = jax.random.normal(k_w2, (hidden_size, out_features), jnp.float32) * 0.02
    b2 = jax.random.normal(k_b2, (out_features,), jnp.float32) * 0.02

    # f32 path (exact check against the PyTorch-equivalent reference).
    out = jax.block_until_ready(pixart_alpha_text_projection(caption, w1, b1, w2, b2))
    ref = _reference(caption, w1, b1, w2, b2)
    assert out.shape == (batch, seq, out_features)
    assert jnp.allclose(out, ref, atol=1e-5, rtol=1e-5)

    # bf16 fast path (production precision: bf16 MXU operands, f32 accumulation).
    cap_bf = caption.astype(jnp.bfloat16)
    w1_bf, w2_bf = w1.astype(jnp.bfloat16), w2.astype(jnp.bfloat16)
    out_bf = jax.block_until_ready(
        pixart_alpha_text_projection(cap_bf, w1_bf, b1, w2_bf, b2))
    ref_bf = _reference(cap_bf, w1_bf, b1, w2_bf, b2)
    assert out_bf.shape == (batch, seq, out_features)
    assert jnp.allclose(out_bf.astype(jnp.float32), ref_bf.astype(jnp.float32),
                        atol=2e-2, rtol=2e-2)

    print("KERNEL_OK")
</pallas_src>

<mosaic_0001>
module attributes {stable_mosaic.version = 11 : i64} {
  func.func @_text_proj_kernel(%arg0: i32, %arg1: i32, %arg2: memref<16x128xf32, #tpu.memory_space<vmem>>, %arg3: memref<128x64xf32, #tpu.memory_space<vmem>>, %arg4: memref<1x64xf32, #tpu.memory_space<vmem>>, %arg5: memref<64x64xf32, #tpu.memory_space<vmem>>, %arg6: memref<1x64xf32, #tpu.memory_space<vmem>>, %arg7: memref<16x64xf32, #tpu.memory_space<vmem>>, %arg8: memref<16x64xf32, #tpu.memory_space<vmem>>) attributes {dimension_semantics = [#tpu.dimension_semantics<parallel>, #tpu.dimension_semantics<arbitrary>], iteration_bounds = array<i64: 1, 1>, scalar_prefetch = 0 : i64, scratch_operands = 1 : i64, tpu.core_type = #tpu.core_type<tc>, window_params = [{transform_indices = @transform_0, window_bounds = array<i64: 16, 128>}, {transform_indices = @transform_1, window_bounds = array<i64: 128, 64>}, {pipeline_mode = #tpu.pipeline_mode<synchronous>, transform_indices = @transform_2, window_bounds = array<i64: 1, 64>}, {pipeline_mode = #tpu.pipeline_mode<synchronous>, transform_indices = @transform_3, window_bounds = array<i64: 64, 64>}, {pipeline_mode = #tpu.pipeline_mode<synchronous>, transform_indices = @transform_4, window_bounds = array<i64: 1, 64>}, {transform_indices = @transform_5, window_bounds = array<i64: 16, 64>}]} {
    %c0_i32 = arith.constant 0 : i32
    %0 = arith.cmpi eq, %arg1, %c0_i32 : i32
    %1 = arith.extui %0 : i1 to i32
    %c0_i32_0 = arith.constant 0 : i32
    %2 = arith.cmpi ne, %1, %c0_i32_0 : i32
    scf.if %2 {
      %cst_10 = arith.constant 0.000000e+00 : f32
      %12 = vector.broadcast %cst_10 : f32 to vector<16x64xf32>
      %c0_11 = arith.constant 0 : index
      %c0_12 = arith.constant 0 : index
      %13 = vector.load %arg8[%c0_11, %c0_12] : memref<16x64xf32, #tpu.memory_space<vmem>>, vector<16x64xf32>
      tpu.vector_store %arg8[%c0_11, %c0_12], %12 {strides = array<i32>} : memref<16x64xf32, #tpu.memory_space<vmem>>, vector<16x64xf32>,
    } else {
    }
    %c0 = arith.constant 0 : index
    %c0_1 = arith.constant 0 : index
    %3 = vector.load %arg8[%c0, %c0_1] : memref<16x64xf32, #tpu.memory_space<vmem>>, vector<16x64xf32>
    %c0_2 = arith.constant 0 : index
    %c0_3 = arith.constant 0 : index
    %4 = vector.load %arg2[%c0_2, %c0_3] : memref<16x128xf32, #tpu.memory_space<vmem>>, vector<16x128xf32>
    %c0_4 = arith.constant 0 : index
    %c0_5 = arith.constant 0 : index
    %5 = vector.load %arg3[%c0_4, %c0_5] : memref<128x64xf32, #tpu.memory_space<vmem>>, vector<128x64xf32>
    %cst = arith.constant dense<0.000000e+00> : vector<16x64xf32>
    %6 = tpu.matmul %4, %5, %cst {dimension_numbers = #tpu.dot_dimension_numbers<[1], [0], [0], [1], [0, 0, 1, 1], [], []>} : vector<16x128xf32>, vector<128x64xf32>, vector<16x64xf32> -> vector<16x64xf32>
    %7 = arith.addf %3, %6 : vector<16x64xf32>
    %c0_6 = arith.constant 0 : index
    %c0_7 = arith.constant 0 : index
    %8 = vector.load %arg8[%c0_6, %c0_7] : memref<16x64xf32, #tpu.memory_space<vmem>>, vector<16x64xf32>
    tpu.vector_store %arg8[%c0_6, %c0_7], %7 {strides = array<i32>} : memref<16x64xf32, #tpu.memory_space<vmem>>, vector<16x64xf32>,
    %c0_i32_8 = arith.constant 0 : i32
    %9 = arith.cmpi eq, %arg1, %c0_i32_8 : i32
    %10 = arith.extui %9 : i1 to i32
    %c0_i32_9 = arith.constant 0 : i32
    %11 = arith.cmpi ne, %10, %c0_i32_9 : i32
    scf.if %11 {
      %c0_10 = arith.constant 0 : index
      %c0_11 = arith.constant 0 : index
      %12 = vector.load %arg8[%c0_10, %c0_11] : memref<16x64xf32, #tpu.memory_space<vmem>>, vector<16x64xf32>
      %c0_12 = arith.constant 0 : index
      %c0_13 = arith.constant 0 : index
      %13 = vector.load %arg4[%c0_12, %c0_13] : memref<1x64xf32, #tpu.memory_space<vmem>>, vector<1x64xf32>
      %14 = vector.broadcast %13 : vector<1x64xf32> to vector<16x64xf32>
      %15 = arith.addf %12, %14 : vector<16x64xf32>
      %cst_14 = arith.constant 5.000000e-01 : f32
      %16 = vector.broadcast %cst_14 : f32 to vector<16x64xf32>
      %17 = arith.mulf %16, %15 : vector<16x64xf32>
      %cst_15 = arith.constant 4.471500e-02 : f32
      %18 = vector.broadcast %cst_15 : f32 to vector<16x64xf32>
      %19 = arith.mulf %18, %15 : vector<16x64xf32>
      %20 = arith.mulf %19, %15 : vector<16x64xf32>
      %21 = arith.mulf %20, %15 : vector<16x64xf32>
      %22 = arith.addf %15, %21 : vector<16x64xf32>
      %cst_16 = arith.constant 0.797884583 : f32
      %23 = vector.broadcast %cst_16 : f32 to vector<16x64xf32>
      %24 = arith.mulf %23, %22 : vector<16x64xf32>
      %25 = math.tanh %24 : vector<16x64xf32>
      %cst_17 = arith.constant 1.000000e+00 : f32
      %26 = vector.broadcast %cst_17 : f32 to vector<16x64xf32>
      %27 = arith.addf %26, %25 : vector<16x64xf32>
      %28 = arith.mulf %17, %27 : vector<16x64xf32>
      %c0_18 = arith.constant 0 : index
      %c0_19 = arith.constant 0 : index
      %29 = vector.load %arg5[%c0_18, %c0_19] : memref<64x64xf32, #tpu.memory_space<vmem>>, vector<64x64xf32>
      %cst_20 = arith.constant dense<0.000000e+00> : vector<16x64xf32>
      %30 = tpu.matmul %28, %29, %cst_20 {dimension_numbers = #tpu.dot_dimension_numbers<[1], [0], [0], [1], [0, 0, 1, 1], [], []>} : vector<16x64xf32>, vector<64x64xf32>, vector<16x64xf32> -> vector<16x64xf32>
      %c0_21 = arith.constant 0 : index
      %c0_22 = arith.constant 0 : index
      %31 = vector.load %arg6[%c0_21, %c0_22] : memref<1x64xf32, #tpu.memory_space<vmem>>, vector<1x64xf32>
      %32 = vector.broadcast %31 : vector<1x64xf32> to vector<16x64xf32>
      %33 = arith.addf %30, %32 : vector<16x64xf32>
      %c0_23 = arith.constant 0 : index
      %c0_24 = arith.constant 0 : index
      %34 = vector.load %arg7[%c0_23, %c0_24] : memref<16x64xf32, #tpu.memory_space<vmem>>, vector<16x64xf32>
      tpu.vector_store %arg7[%c0_23, %c0_24], %33 {strides = array<i32>} : memref<16x64xf32, #tpu.memory_space<vmem>>, vector<16x64xf32>,
    } else {
    }
    return
  }
  func.func @transform_0(%arg0: i32, %arg1: i32) -> (i32, i32) {
    %c0_i32 = arith.constant 0 : i32
    return %arg0, %arg1 : i32, i32
  }
  func.func @transform_1(%arg0: i32, %arg1: i32) -> (i32, i32) {
    %c0_i32 = arith.constant 0 : i32
    %c0_i32_0 = arith.constant 0 : i32
    return %arg1, %c0_i32 : i32, i32
  }
  func.func @transform_2(%arg0: i32, %arg1: i32) -> (i32, i32) {
    %c0_i32 = arith.constant 0 : i32
    %c0_i32_0 = arith.constant 0 : i32
    %c0_i32_1 = arith.constant 0 : i32
    return %c0_i32, %c0_i32_0 : i32, i32
  }
  func.func @transform_3(%arg0: i32, %arg1: i32) -> (i32, i32) {
    %c0_i32 = arith.constant 0 : i32
    %c0_i32_0 = arith.constant 0 : i32
    %c0_i32_1 = arith.constant 0 : i32
    return %c0_i32, %c0_i32_0 : i32, i32
  }
  func.func @transform_4(%arg0: i32, %arg1: i32) -> (i32, i32) {
    %c0_i32 = arith.constant 0 : i32
    %c0_i32_0 = arith.constant 0 : i32
    %c0_i32_1 = arith.constant 0 : i32
    return %c0_i32, %c0_i32_0 : i32, i32
  }
  func.func @transform_5(%arg0: i32, %arg1: i32) -> (i32, i32) {
    %c0_i32 = arith.constant 0 : i32
    %c0_i32_0 = arith.constant 0 : i32
    return %arg0, %c0_i32 : i32, i32
  }
}

</mosaic_0001>

<bundles_post_ra>
// kernel: tpu_custom_call.1
= control target key start
LH: loop header
LB: loop body
LE: loop exit
PB: predicated region body
PF: predicated region fallthrough
CT: control target
= control target key end

     0   :  { %vm25_vm0 = vcmask 523264   ;;  %v390_v2 = vmov 0.0   ;;  %s519_s0 = inlined_call_operand.vmem [shape: f32[16,128], index: 0, kind: input, shape index: {}]   ;;  %s520_s1 = inlined_call_operand.vmem [shape: f32[128,64], index: 1, kind: input, shape index: {}]   ;;  %s521_s2 = inlined_call_operand.vmem [shape: f32[1,64], index: 2, kind: input, shape index: {}]   ;;  %s522_s3 = inlined_call_operand.vmem [shape: f32[64,64], index: 3, kind: input, shape index: {}]   ;;  %s523_s4 = inlined_call_operand.vmem [shape: f32[1,64], index: 4, kind: input, shape index: {}]   ;;  %s524_s5 = inlined_call_operand.hbm [shape: f32[16,64], index: 5, kind: output, shape index: {}]  }
   0x1   :  { %v47_v0 = vld [vmem:[%s520_s1 + $0x78] sm:$0xff]  ;;  %v46_v1 = vld [vmem:[%s520_s1 + $0x70] sm:$0xff]  ;;  %27 = vst.msk [vmem:[#allocation2 + $0x8] sm:$0xff] %vm25_vm0, %v390_v2  ;;  %26 = vst.msk [vmem:[#allocation2] sm:$0xff] %vm25_vm0, %v390_v2 }
   0x2   :  { %306 = vmatprep.subr.mxu0 %v47_v0  ;;  %v45_v3 = vld [vmem:[%s520_s1 + $0x68] sm:$0xff]  ;;  %v44_v4 = vld [vmem:[%s520_s1 + $0x60] sm:$0xff]  ;;  %v43_v6 = vld [vmem:[%s520_s1 + $0x58] sm:$0xff] }
   0x3   :  { %307 = vmatpush3.msra.mxu0 %v47_v0  ;;  %v30_v5 = vld [vmem:[%s519_s0] sm:$0xff] }
   0x4   :  { %308 = vmatprep.subr.mxu0 %v46_v1  ;;  %338 = vmatprep.mubr.f32.mxu0 %v30_v5 }
   0x5   :  { %309 = vmatpush3.msra.mxu0 %v46_v1 }
   0x6   :  { %310 = vmatprep.subr.mxu0 %v45_v3 }
   0x7   :  { %311 = vmatpush3.msra.mxu0 %v45_v3 }
   0x8   :  { %10 = vsyncpa [#allocation4], 0  ;;  %312 = vmatprep.subr.mxu0 %v44_v4  ;;  %v42_v7 = vld [vmem:[%s520_s1 + $0x50] sm:$0xff]  ;;  %v41_v8 = vld [vmem:[%s520_s1 + $0x48] sm:$0xff]  ;;  %s391_s20 = smov [#allocation3]  }
   0x9   :  { %313 = vmatpush3.msra.mxu0 %v44_v4  ;;  %v40_v9 = vld [vmem:[%s520_s1 + $0x40] sm:$0xff]  ;;  %v39_v10 = vld [vmem:[%s520_s1 + $0x38] sm:$0xff]  ;;  %v38_v11 = vld [vmem:[%s520_s1 + $0x30] sm:$0xff]  ;;  %s263_s21 = sshll.u32 %s391_s20, 4  ;;  %s264_s21 = int_to_ptr.vmem [resolvable:$true] %s263_s21 }
   0xa   :  { %314 = vmatprep.subr.mxu0 %v43_v6  ;;  %v37_v12 = vld [vmem:[%s520_s1 + $0x28] sm:$0xff]  ;;  %v36_v13 = vld [vmem:[%s520_s1 + $0x20] sm:$0xff]  ;;  %v35_v14 = vld [vmem:[%s520_s1 + $0x18] sm:$0xff]  ;;  %s368_s22 = scalar_lea.vmem %s264_s21, 256  ;;  %p373_p1 = scmp.lt.s32.totalorder %s264_s21, %s264_s21 }
   0xb   :  { %315 = vmatpush3.msra.mxu0 %v43_v6  ;;  %v34_v15 = vld [vmem:[%s520_s1 + $0x10] sm:$0xff]  ;;  %v33_v16 = vld [vmem:[%s520_s1 + $0x8] sm:$0xff]  ;;  %v32_v17 = vld [vmem:[%s520_s1] sm:$0xff]  ;;  %p369_p0 = scmp.ne.s32.totalorder %s264_s21, %s368_s22  ;;  %p374_p2 = scmp.lt.s32.totalorder %s368_s22, %s368_s22 }
   0xc   :  { %316 = vmatprep.subr.mxu0 %v42_v7  ;;  %v31_v18 = vld [vmem:[%s519_s0 + $0x8] sm:$0xff]  ;;  %v167_v19 = vld [vmem:[%s522_s3 + $0x38] sm:$0xff]  ;;  %v166_v20 = vld [vmem:[%s522_s3 + $0x30] sm:$0xff] }
   0xd   :  { %317 = vmatpush3.msra.mxu0 %v42_v7  ;;  %341 = vmatprep.subr.mxu1 %v167_v19  ;;  %v165_v21 = vld [vmem:[%s522_s3 + $0x28] sm:$0xff]  ;;  %v164_v22 = vld [vmem:[%s522_s3 + $0x20] sm:$0xff]  ;;  %v163_v23 = vld [vmem:[%s522_s3 + $0x18] sm:$0xff]  ;;  %p375_p3 = por %p374_p2, %p373_p1 }
   0xe   :  { %318 = vmatprep.subr.mxu0 %v41_v8  ;;  %342 = vmatpush3.msra.mxu1 %v167_v19  ;;  %v162_v24 = vld [vmem:[%s522_s3 + $0x10] sm:$0xff]  ;;  %v161_v25 = vld [vmem:[%s522_s3 + $0x8] sm:$0xff]  ;;  %v160_v26 = vld [vmem:[%s522_s3] sm:$0xff] }
   0xf   :  { %319 = vmatpush3.msra.mxu0 %v41_v8  ;;  %343 = vmatprep.subr.mxu1 %v166_v20  ;;  %v29_v27 = vld [vmem:[#allocation2 + $0x8] sm:$0xff]  ;;  %v28_v29 = vld [vmem:[#allocation2] sm:$0xff]  ;;  %p376_p4 = pnand %p375_p3, %p369_p0 }
  0x10   :  { %320 = vmatprep.subr.mxu0 %v40_v9  ;;  %344 = vmatpush3.msra.mxu1 %v166_v20  ;;  %v274_v33 = vld [vmem:[%s521_s2] ss:$0 sm:$0xff] }
  0x11   :  { %321 = vmatpush3.msra.mxu0 %v40_v9  ;;  %345 = vmatprep.subr.mxu1 %v165_v21  ;;  %v275_v56 = vld [vmem:[%s523_s4] ss:$0 sm:$0xff] }
  0x12   :  { %322 = vmatprep.subr.mxu0 %v39_v10  ;;  %346 = vmatpush3.msra.mxu1 %v165_v21 }
  0x13   :  { %323 = vmatpush3.msra.mxu0 %v39_v10  ;;  %347 = vmatprep.subr.mxu1 %v164_v22 }
  0x14   :  { %324 = vmatprep.subr.mxu0 %v38_v11  ;;  %348 = vmatpush3.msra.mxu1 %v164_v22 }
  0x15   :  { %325 = vmatpush3.msra.mxu0 %v38_v11  ;;  %349 = vmatprep.subr.mxu1 %v163_v23 }
  0x16   :  { %326 = vmatprep.subr.mxu0 %v37_v12  ;;  %350 = vmatpush3.msra.mxu1 %v163_v23 }
  0x17   :  { %327 = vmatpush3.msra.mxu0 %v37_v12  ;;  %351 = vmatprep.subr.mxu1 %v162_v24 }
  0x18   :  { %328 = vmatprep.subr.mxu0 %v36_v13  ;;  %352 = vmatpush3.msra.mxu1 %v162_v24 }
  0x19   :  { %329 = vmatpush3.msra.mxu0 %v36_v13  ;;  %353 = vmatprep.subr.mxu1 %v161_v25 }
  0x1a   :  { %330 = vmatprep.subr.mxu0 %v35_v14  ;;  %354 = vmatpush3.msra.mxu1 %v161_v25 }
  0x1b   :  { %331 = vmatpush3.msra.mxu0 %v35_v14  ;;  %355 = vmatprep.subr.mxu1 %v160_v26 }
  0x1c   :  { %332 = vmatprep.subr.mxu0 %v34_v15  ;;  %356 = vmatpush3.msra.mxu1 %v160_v26 }
  0x1d   :  { %333 = vmatpush3.msra.mxu0 %v34_v15 }
  0x1e   :  { %334 = vmatprep.subr.mxu0 %v33_v16 }
  0x1f   :  { %335 = vmatpush3.msra.mxu0 %v33_v16 }
  0x20   :  { %336 = vmatprep.subr.mxu0 %v32_v17 }
  0x21   :  { %337 = vmatpush3.msra.mxu0 %v32_v17 }
  0x22   :  { %339 = vmatmul.mubr.f32.vlgmr.msra.gmra.mxu0 %v31_v18 }
  0xe2   :  { %v340_v28 = vpop.f32.mrf.mxu0 }
  0xe3   :  { %v124_v30 = vadd.f32 %v340_v28, %v29_v27 }
  0xe4   :  { %v114_v31 = vpop.f32.mrf.mxu0 }
  0xe5   :  { %127 = vst.msk [vmem:[#allocation2 + $0x8] sm:$0xff] %vm25_vm0, %v124_v30  ;;  %v123_v32 = vadd.f32 %v114_v31, %v28_v29 }
  0xe7   :  { %126 = vst.msk [vmem:[#allocation2] sm:$0xff] %vm25_vm0, %v123_v32 }
  0xec   :  { %v132_v34 = vld [vmem:[#allocation2 + $0x8] sm:$0xff] }
  0xed   :  { %v141_v35 = vadd.f32 %v274_v33, %v132_v34 }
  0xee   :  { %v131_v36 = vld [vmem:[#allocation2] sm:$0xff] }
  0xef   :  { %v140_v37 = vadd.f32 %v274_v33, %v131_v36  ;;  %v145_v38 = vmul.f32 0.044715, %v141_v35  ;;  %v143_v53 = vmul.f32 0.5, %v141_v35 }
  0xf1   :  { %v144_v39 = vmul.f32 0.044715, %v140_v37  ;;  %v147_v40 = vmul.f32 %v145_v38, %v141_v35  ;;  %v142_v51 = vmul.f32 0.5, %v140_v37 }
  0xf3   :  { %v146_v41 = vmul.f32 %v144_v39, %v140_v37  ;;  %v149_v42 = vmul.f32 %v147_v40, %v141_v35 }
  0xf5   :  { %v148_v43 = vmul.f32 %v146_v41, %v140_v37  ;;  %v151_v44 = vadd.f32 %v149_v42, %v141_v35 }
  0xf7   :  { %v150_v45 = vadd.f32 %v148_v43, %v140_v37  ;;  %v153_v46 = vmul.f32 0.7978846, %v151_v44 }
  0xf9   :  { %v152_v47 = vmul.f32 0.7978846, %v150_v45  ;;  %364 = vtanh.f32 %v153_v46 }
  0xfb   :  { %366 = vtanh.f32 %v152_v47 }
 0x106   :  { %v365_v48 = vpop.eup %364 }
 0x107   :  { %v157_v50 = vadd.f32 1.0, %v365_v48 }
 0x108   :  { %v367_v49 = vpop.eup %366 }
 0x109   :  { %v156_v52 = vadd.f32 1.0, %v367_v49  ;;  %v159_v55 = vmul.f32 %v157_v50, %v143_v53 }
 0x10b   :  { %v158_v54 = vmul.f32 %v156_v52, %v142_v51 }
 0x10d   :  { %357 = vmatprep.mubr.msk.f32.mxu1 %vm25_vm0, %v158_v54 }
 0x10e   :  { %358 = vmatmul.mubr.msk.f32.vlgmr.msra.gmra.mxu1 %vm25_vm0, %v159_v55 }
 0x1ce   :  { %v359_v57 = vpop.f32.mrf.mxu1 }
 0x1cf   :  { %v253_v58 = vadd.f32 %v359_v57, %v275_v56 }
 0x1d0   :  { %v247_v59 = vpop.f32.mrf.mxu1 }
 0x1d1   :  { %257 = vst.msk [vmem:[#allocation3 + $0x8] sm:$0xff] %vm25_vm0, %v253_v58  ;;  %v248_v60 = vadd.f32 %v275_v56, %v247_v59 }
 0x1d3   :  { %256 = vst.msk [vmem:[#allocation3] sm:$0xff] %vm25_vm0, %v248_v60 }
 0x1d4   :  { %379 = shalt.err (!%p376_p4)
}
 0x1d5   :  { %s392_s23 = smov 128   ;;  %s393_s4 = smov 8  }
 0x1d6   :  { %269 = dma.vmem_to_hbm [thread:$0]  %s264_s21, 256, %s524_s5, [#allocation4], %s392_s23, %s392_s23, %s393_s4  }
 0x1d7   :  { %388 = dma.done.wait [#allocation4], 256  }
 0x1d8   :  { %389 = vsyncadd [#allocation4], 4294967040 }
 0x1d9   :  { %273 = vsyncpa [#allocation4], 1 }

</bundles_post_ra>
